<compile_context>
chip_gen: v7x
topology: tpu7x:2x2x1
jax: 0.10.0
libtpu: 0.0.40
codegen_flags: <defaults>
</compile_context>

<pallas_src>
import functools

import numpy as np
import jax
import jax.numpy as jnp
from jax.experimental import pallas as pl
from jax.experimental.pallas import tpu as pltpu


# ---------------------------------------------------------------------------
# Fused kernel: 1x1 conv + ReLU + adaptive-avg-pool (+ optional L2 normalize)
# ---------------------------------------------------------------------------
def _fused_kernel(x_ref, w_ref, b_ref, m_ref, sc_ref, o_ref, *, ts, n_s, normalize):
    s = pl.program_id(1)

    @pl.when(s == 0)
    def _():
        o_ref[...] = jnp.zeros_like(o_ref)

    # Stage 1: 1x1 conv + ReLU. Channels on sublanes, H*W (lane-dense) on lanes.
    xb = x_ref[...].astype(jnp.bfloat16)                                   # (C_in, ts)
    feat = jnp.dot(w_ref[...], xb, preferred_element_type=jnp.float32)     # (C_out, ts) f32
    feat = jnp.maximum(feat + b_ref[...], 0.0)

    # Stage 2: adaptive-avg-pool partial SUMS as a bf16 MXU matmul against a
    # 0/1 membership matrix (exact w.r.t. the bf16 feat, f32 accumulation).
    if n_s == 1:
        m_tile = m_ref[...]                                                # (ts, P*P)
    else:
        start = pl.multiple_of(s * ts, ts)
        m_tile = m_ref[pl.ds(start, ts), :]
    o_ref[...] += jnp.dot(feat.astype(jnp.bfloat16), m_tile,
                          preferred_element_type=jnp.float32)              # (C_out, P*P)

    @pl.when(s == pl.num_programs(1) - 1)
    def _():
        pooled = o_ref[...] * sc_ref[...]                # per-bin 1/area scale (VPU)
        if normalize:
            # L2 norm over the whole flattened row (permutation invariant, so
            # normalizing in (C_out, P*P) layout equals torch's view->normalize).
            # sqrt(0) -> 0 -> divide -> NaN on all-zero rows, matching torch.
            sumsq = jnp.sum(pooled * pooled, keepdims=True)
            pooled = pooled / jnp.sqrt(sumsq)
        o_ref[...] = pooled


# ---------------------------------------------------------------------------
# Host-side helpers
# ---------------------------------------------------------------------------
def _pool_membership(H, W, P, hw_pad):
    """0/1 membership matrix (hw_pad, P*P) in bf16 + per-bin 1/area (1, P*P) f32.

    Uses torch AdaptiveAvgPool2d floor/ceil bin boundaries (bins may overlap
    when P does not divide H or W).  Padded spatial rows stay all-zero.
    """
    M = np.zeros((hw_pad, P * P), dtype=np.float32)
    inv_area = np.zeros((1, P * P), dtype=np.float32)
    for i in range(P):
        h0, h1 = (i * H) // P, -(-((i + 1) * H) // P)
        for j in range(P):
            w0, w1 = (j * W) // P, -(-((j + 1) * W) // P)
            p = i * P + j
            inv_area[0, p] = 1.0 / float((h1 - h0) * (w1 - w0))
            for h in range(h0, h1):
                M[h * W + w0: h * W + w1, p] = 1.0
    return jnp.asarray(M, dtype=jnp.bfloat16), jnp.asarray(inv_area, dtype=jnp.float32)


def _choose_tiling(hw, max_tile):
    """Return (tile_size, padded_hw). Tiles are lane-aligned; pad instead of
    silently falling back to a huge full-extent tile."""
    if hw <= max_tile:
        return hw, hw                              # full extent (always legal)
    ts = max(max_tile - (max_tile % 128), 128)     # lane-aligned tile
    hw_pad = ((hw + ts - 1) // ts) * ts
    return ts, hw_pad


# ---------------------------------------------------------------------------
# FeatureExtractor forward
# ---------------------------------------------------------------------------
@functools.partial(jax.jit,
                   static_argnames=("pool_size", "flatten_and_normalize", "max_tile"))
def feature_extractor(images_nchw, w, bias, *, pool_size=2,
                      flatten_and_normalize=True, max_tile=2048):
    B, C_in, H, W = images_nchw.shape
    C_out = w.shape[1]
    P = pool_size
    HW = H * W
    ts, hw_pad = _choose_tiling(HW, max_tile)
    n_s = hw_pad // ts

    # Stay in NCHW: free reshape, no transpose / cast passes over HBM.
    x = images_nchw.reshape(B, C_in, HW)
    if hw_pad != HW:
        x = jnp.pad(x, ((0, 0), (0, 0), (0, hw_pad - HW)))

    wt = jnp.transpose(w).astype(jnp.bfloat16)               # (C_out, C_in), tiny
    b_col = bias.astype(jnp.float32).reshape(C_out, 1)
    m_bf16, inv_area = _pool_membership(H, W, P, hw_pad)     # (hw_pad, P*P), (1, P*P)

    kernel = functools.partial(_fused_kernel, ts=ts, n_s=n_s,
                               normalize=flatten_and_normalize)

    flops = 2 * B * hw_pad * C_in * C_out + 2 * B * hw_pad * C_out * P * P
    bytes_accessed = (x.size * x.dtype.itemsize + wt.size * 2 + b_col.size * 4
                      + m_bf16.size * 2 + inv_area.size * 4 + B * C_out * P * P * 4)

    pooled = pl.pallas_call(
        kernel,
        out_shape=jax.ShapeDtypeStruct((B, C_out, P * P), jnp.float32),
        grid=(B, n_s),
        in_specs=[
            pl.BlockSpec((None, C_in, ts), lambda b, s: (b, 0, s)),   # x tile (NCHW)
            pl.BlockSpec((C_out, C_in), lambda b, s: (0, 0)),         # weights (resident)
            pl.BlockSpec((C_out, 1), lambda b, s: (0, 0)),            # bias    (resident)
            pl.BlockSpec((hw_pad, P * P), lambda b, s: (0, 0)),       # membership (resident)
            pl.BlockSpec((1, P * P), lambda b, s: (0, 0)),            # 1/area  (resident)
        ],
        out_specs=pl.BlockSpec((None, C_out, P * P), lambda b, s: (b, 0, 0)),
        compiler_params=pltpu.CompilerParams(
            dimension_semantics=("parallel", "arbitrary"),
            vmem_limit_bytes=32 * 1024 * 1024),
        cost_estimate=pl.CostEstimate(flops=flops, transcendentals=B,
                                      bytes_accessed=bytes_accessed),
    )(x, wt, b_col, m_bf16, inv_area)

    # (B, C, P*P) is already torch's C-major order: plain reshapes, no transpose.
    if flatten_and_normalize:
        return pooled.reshape(B, C_out * P * P)
    return pooled.reshape(B, C_out, P, P)


# ---------------------------------------------------------------------------
# Pure-jnp reference (independent adaptive-pool implementation, torch bins)
# ---------------------------------------------------------------------------
def _adaptive_pool_ref(feat_nchw, P):
    B, C, H, W = feat_nchw.shape
    rows = []
    for i in range(P):
        h0, h1 = (i * H) // P, -(-((i + 1) * H) // P)
        cols = []
        for j in range(P):
            w0, w1 = (j * W) // P, -(-((j + 1) * W) // P)
            cols.append(feat_nchw[:, :, h0:h1, w0:w1].mean(axis=(2, 3)))
        rows.append(jnp.stack(cols, axis=-1))
    return jnp.stack(rows, axis=-2)                                 # (B, C, P, P)


def _reference(images_nchw, w, bias, pool_size, flatten_and_normalize):
    B = images_nchw.shape[0]
    # Mirror the kernel's bf16 MXU operands (f32 accumulation) for the conv.
    xq = images_nchw.astype(jnp.bfloat16).astype(jnp.float32)
    wq = w.astype(jnp.bfloat16).astype(jnp.float32)
    feat = jnp.einsum("bchw,cn->bnhw", xq, wq, precision=jax.lax.Precision.HIGHEST)
    feat = jnp.maximum(feat + bias[None, :, None, None], 0.0)
    # Mirror the kernel's bf16 feed into the pooling matmul.
    feat = feat.astype(jnp.bfloat16).astype(jnp.float32)
    pooled = _adaptive_pool_ref(feat, pool_size)                    # (B, C, P, P)
    if flatten_and_normalize:
        flat = pooled.reshape(B, -1)
        return flat / jnp.linalg.norm(flat, axis=-1, keepdims=True)
    return pooled


if __name__ == "__main__":
    key = jax.random.PRNGKey(0)
    k_img, k_w, k_b, k_img2, k_img3 = jax.random.split(key, 5)

    B, C_in, C_out = 2, 4, 32
    w = 0.1 * jax.random.normal(k_w, (C_in, C_out), dtype=jnp.float32)
    bias = 0.1 * jax.random.normal(k_b, (C_out,), dtype=jnp.float32)

    # Test 1: "layer4"-like config — P=2, flatten + L2 normalize.
    H = W = 16
    P = 2
    images = jax.random.normal(k_img, (B, C_in, H, W), dtype=jnp.float32)
    out = feature_extractor(images, w, bias, pool_size=P, flatten_and_normalize=True)
    out = jax.block_until_ready(out)
    ref = _reference(images, w, bias, P, True)
    assert out.shape == (B, C_out * P * P), out.shape
    assert jnp.allclose(out, ref, atol=1e-4, rtol=1e-4), (
        "mismatch (test1): %g" % float(jnp.max(jnp.abs(out - ref))))

    # Test 2: ragged adaptive-pool bins (H, W not divisible by P), no flatten.
    H2 = W2 = 10
    P2 = 3
    images2 = jax.random.normal(k_img2, (B, C_in, H2, W2), dtype=jnp.float32)
    out2 = feature_extractor(images2, w, bias, pool_size=P2, flatten_and_normalize=False)
    out2 = jax.block_until_ready(out2)
    ref2 = _reference(images2, w, bias, P2, False)
    assert out2.shape == (B, C_out, P2, P2), out2.shape
    assert jnp.allclose(out2, ref2, atol=1e-4, rtol=1e-4), (
        "mismatch (test2): %g" % float(jnp.max(jnp.abs(out2 - ref2))))

    # Test 3: spatial tiling + zero-padding path (H*W > max_tile, non-divisible).
    H3 = W3 = 40                    # HW=1600 > max_tile=512 -> ts=512, padded to 2048
    P3 = 2
    images3 = jax.random.normal(k_img3, (B, C_in, H3, W3), dtype=jnp.float32)
    out3 = feature_extractor(images3, w, bias, pool_size=P3,
                             flatten_and_normalize=True, max_tile=512)
    out3 = jax.block_until_ready(out3)
    ref3 = _reference(images3, w, bias, P3, True)
    assert out3.shape == (B, C_out * P3 * P3), out3.shape
    assert jnp.allclose(out3, ref3, atol=1e-4, rtol=1e-4), (
        "mismatch (test3): %g" % float(jnp.max(jnp.abs(out3 - ref3))))

    print("KERNEL_OK")
</pallas_src>

<mosaic_0001>
module attributes {stable_mosaic.version = 11 : i64} {
  func.func @_fused_kernel(%arg0: i32, %arg1: i32, %arg2: memref<1x4x256xf32, #tpu.memory_space<vmem>>, %arg3: memref<32x4xbf16, #tpu.memory_space<vmem>>, %arg4: memref<32x1xf32, #tpu.memory_space<vmem>>, %arg5: memref<256x4xbf16, #tpu.memory_space<vmem>>, %arg6: memref<1x4xf32, #tpu.memory_space<vmem>>, %arg7: memref<1x32x4xf32, #tpu.memory_space<vmem>>) attributes {dimension_semantics = [#tpu.dimension_semantics<parallel>, #tpu.dimension_semantics<arbitrary>], iteration_bounds = array<i64: 2, 1>, scalar_prefetch = 0 : i64, scratch_operands = 0 : i64, tpu.core_type = #tpu.core_type<tc>, window_params = [{transform_indices = @transform_0, window_bounds = array<i64: 1, 4, 256>}, {pipeline_mode = #tpu.pipeline_mode<synchronous>, transform_indices = @transform_1, window_bounds = array<i64: 32, 4>}, {pipeline_mode = #tpu.pipeline_mode<synchronous>, transform_indices = @transform_2, window_bounds = array<i64: 32, 1>}, {pipeline_mode = #tpu.pipeline_mode<synchronous>, transform_indices = @transform_3, window_bounds = array<i64: 256, 4>}, {pipeline_mode = #tpu.pipeline_mode<synchronous>, transform_indices = @transform_4, window_bounds = array<i64: 1, 4>}, {transform_indices = @transform_5, window_bounds = array<i64: 1, 32, 4>}]} {
    %c0_i32 = arith.constant 0 : i32
    %0 = arith.cmpi eq, %arg1, %c0_i32 : i32
    %1 = arith.extui %0 : i1 to i32
    %c0_i32_0 = arith.constant 0 : i32
    %2 = arith.cmpi ne, %1, %c0_i32_0 : i32
    scf.if %2 {
      %cst_19 = arith.constant 0.000000e+00 : f32
      %25 = vector.broadcast %cst_19 : f32 to vector<32x4xf32>
      %c0_20 = arith.constant 0 : index
      %c0_21 = arith.constant 0 : index
      %c0_22 = arith.constant 0 : index
      %26 = vector.load %arg7[%c0_20, %c0_21, %c0_22] : memref<1x32x4xf32, #tpu.memory_space<vmem>>, vector<1x32x4xf32>
      %27 = vector.shape_cast %26 : vector<1x32x4xf32> to vector<32x4xf32>
      %28 = vector.shape_cast %25 : vector<32x4xf32> to vector<1x32x4xf32>
      tpu.vector_store %arg7[%c0_20, %c0_21, %c0_22], %28 {strides = array<i32>} : memref<1x32x4xf32, #tpu.memory_space<vmem>>, vector<1x32x4xf32>,
    } else {
    }
    %c0 = arith.constant 0 : index
    %c0_1 = arith.constant 0 : index
    %c0_2 = arith.constant 0 : index
    %3 = vector.load %arg2[%c0, %c0_1, %c0_2] : memref<1x4x256xf32, #tpu.memory_space<vmem>>, vector<1x4x256xf32>
    %4 = vector.shape_cast %3 : vector<1x4x256xf32> to vector<4x256xf32>
    %5 = arith.truncf %4 : vector<4x256xf32> to vector<4x256xbf16>
    %c0_3 = arith.constant 0 : index
    %c0_4 = arith.constant 0 : index
    %6 = vector.load %arg3[%c0_3, %c0_4] : memref<32x4xbf16, #tpu.memory_space<vmem>>, vector<32x4xbf16>
    %cst = arith.constant dense<0.000000e+00> : vector<32x256xf32>
    %7 = tpu.matmul %6, %5, %cst {dimension_numbers = #tpu.dot_dimension_numbers<[1], [0], [0], [1], [0, 0, 1, 1], [], []>} : vector<32x4xbf16>, vector<4x256xbf16>, vector<32x256xf32> -> vector<32x256xf32>
    %c0_5 = arith.constant 0 : index
    %c0_6 = arith.constant 0 : index
    %8 = vector.load %arg4[%c0_5, %c0_6] : memref<32x1xf32, #tpu.memory_space<vmem>>, vector<32x1xf32>
    %9 = vector.broadcast %8 : vector<32x1xf32> to vector<32x256xf32>
    %10 = arith.addf %7, %9 : vector<32x256xf32>
    %cst_7 = arith.constant 0.000000e+00 : f32
    %11 = vector.broadcast %cst_7 : f32 to vector<32x256xf32>
    %12 = arith.maximumf %10, %11 : vector<32x256xf32>
    %c0_8 = arith.constant 0 : index
    %c0_9 = arith.constant 0 : index
    %13 = vector.load %arg5[%c0_8, %c0_9] : memref<256x4xbf16, #tpu.memory_space<vmem>>, vector<256x4xbf16>
    %c0_10 = arith.constant 0 : index
    %c0_11 = arith.constant 0 : index
    %c0_12 = arith.constant 0 : index
    %14 = vector.load %arg7[%c0_10, %c0_11, %c0_12] : memref<1x32x4xf32, #tpu.memory_space<vmem>>, vector<1x32x4xf32>
    %15 = vector.shape_cast %14 : vector<1x32x4xf32> to vector<32x4xf32>
    %16 = arith.truncf %12 : vector<32x256xf32> to vector<32x256xbf16>
    %cst_13 = arith.constant dense<0.000000e+00> : vector<32x4xf32>
    %17 = tpu.matmul %16, %13, %cst_13 {dimension_numbers = #tpu.dot_dimension_numbers<[1], [0], [0], [1], [0, 0, 1, 1], [], []>} : vector<32x256xbf16>, vector<256x4xbf16>, vector<32x4xf32> -> vector<32x4xf32>
    %18 = arith.addf %15, %17 : vector<32x4xf32>
    %c0_14 = arith.constant 0 : index
    %c0_15 = arith.constant 0 : index
    %c0_16 = arith.constant 0 : index
    %19 = vector.load %arg7[%c0_14, %c0_15, %c0_16] : memref<1x32x4xf32, #tpu.memory_space<vmem>>, vector<1x32x4xf32>
    %20 = vector.shape_cast %19 : vector<1x32x4xf32> to vector<32x4xf32>
    %21 = vector.shape_cast %18 : vector<32x4xf32> to vector<1x32x4xf32>
    tpu.vector_store %arg7[%c0_14, %c0_15, %c0_16], %21 {strides = array<i32>} : memref<1x32x4xf32, #tpu.memory_space<vmem>>, vector<1x32x4xf32>,
    %c0_i32_17 = arith.constant 0 : i32
    %22 = arith.cmpi eq, %arg1, %c0_i32_17 : i32
    %23 = arith.extui %22 : i1 to i32
    %c0_i32_18 = arith.constant 0 : i32
    %24 = arith.cmpi ne, %23, %c0_i32_18 : i32
    scf.if %24 {
      %c0_19 = arith.constant 0 : index
      %c0_20 = arith.constant 0 : index
      %c0_21 = arith.constant 0 : index
      %25 = vector.load %arg7[%c0_19, %c0_20, %c0_21] : memref<1x32x4xf32, #tpu.memory_space<vmem>>, vector<1x32x4xf32>
      %26 = vector.shape_cast %25 : vector<1x32x4xf32> to vector<32x4xf32>
      %c0_22 = arith.constant 0 : index
      %c0_23 = arith.constant 0 : index
      %27 = vector.load %arg6[%c0_22, %c0_23] : memref<1x4xf32, #tpu.memory_space<vmem>>, vector<1x4xf32>
      %28 = vector.broadcast %27 : vector<1x4xf32> to vector<32x4xf32>
      %29 = arith.mulf %26, %28 : vector<32x4xf32>
      %30 = arith.mulf %29, %29 : vector<32x4xf32>
      %31 = vector.shape_cast %30 : vector<32x4xf32> to vector<1x32x4xf32>
      %cst_24 = arith.constant dense<0.000000e+00> : vector<1xf32>
      %32 = vector.multi_reduction <add>, %31, %cst_24 [1, 2] : vector<1x32x4xf32> to vector<1xf32>
      %33 = vector.shape_cast %32 : vector<1xf32> to vector<1x1x1xf32>
      %34 = vector.extract %33[0, 0, 0] : f32 from vector<1x1x1xf32>
      %35 = vector.broadcast %34 : f32 to vector<1x1xf32>
      %36 = math.sqrt %35 : vector<1x1xf32>
      %37 = vector.broadcast %36 : vector<1x1xf32> to vector<32x4xf32>
      %38 = arith.divf %29, %37 : vector<32x4xf32>
      %c0_25 = arith.constant 0 : index
      %c0_26 = arith.constant 0 : index
      %c0_27 = arith.constant 0 : index
      %39 = vector.load %arg7[%c0_25, %c0_26, %c0_27] : memref<1x32x4xf32, #tpu.memory_space<vmem>>, vector<1x32x4xf32>
      %40 = vector.shape_cast %39 : vector<1x32x4xf32> to vector<32x4xf32>
      %41 = vector.shape_cast %38 : vector<32x4xf32> to vector<1x32x4xf32>
      tpu.vector_store %arg7[%c0_25, %c0_26, %c0_27], %41 {strides = array<i32>} : memref<1x32x4xf32, #tpu.memory_space<vmem>>, vector<1x32x4xf32>,
    } else {
    }
    return
  }
  func.func @transform_0(%arg0: i32, %arg1: i32) -> (i32, i32, i32) {
    %c0_i32 = arith.constant 0 : i32
    %c0_i32_0 = arith.constant 0 : i32
    return %arg0, %c0_i32, %arg1 : i32, i32, i32
  }
  func.func @transform_1(%arg0: i32, %arg1: i32) -> (i32, i32) {
    %c0_i32 = arith.constant 0 : i32
    %c0_i32_0 = arith.constant 0 : i32
    %c0_i32_1 = arith.constant 0 : i32
    return %c0_i32, %c0_i32_0 : i32, i32
  }
  func.func @transform_2(%arg0: i32, %arg1: i32) -> (i32, i32) {
    %c0_i32 = arith.constant 0 : i32
    %c0_i32_0 = arith.constant 0 : i32
    %c0_i32_1 = arith.constant 0 : i32
    return %c0_i32, %c0_i32_0 : i32, i32
  }
  func.func @transform_3(%arg0: i32, %arg1: i32) -> (i32, i32) {
    %c0_i32 = arith.constant 0 : i32
    %c0_i32_0 = arith.constant 0 : i32
    %c0_i32_1 = arith.constant 0 : i32
    return %c0_i32, %c0_i32_0 : i32, i32
  }
  func.func @transform_4(%arg0: i32, %arg1: i32) -> (i32, i32) {
    %c0_i32 = arith.constant 0 : i32
    %c0_i32_0 = arith.constant 0 : i32
    %c0_i32_1 = arith.constant 0 : i32
    return %c0_i32, %c0_i32_0 : i32, i32
  }
  func.func @transform_5(%arg0: i32, %arg1: i32) -> (i32, i32, i32) {
    %c0_i32 = arith.constant 0 : i32
    %c0_i32_0 = arith.constant 0 : i32
    %c0_i32_1 = arith.constant 0 : i32
    return %arg0, %c0_i32, %c0_i32_0 : i32, i32, i32
  }
}

</mosaic_0001>

<bundles_post_ra>
// kernel: feature_extractor.1
= control target key start
LH: loop header
LB: loop body
LE: loop exit
PB: predicated region body
PF: predicated region fallthrough
CT: control target
= control target key end

     0   :  { %s887_s18 = smov 0   ;;  %s889_s19 = smov 0   ;;  %s1033_s0 = inlined_call_operand.vmem [shape: f32[2,4,256], index: 0, kind: input, shape index: {}]   ;;  %s1034_s1 = inlined_call_operand.vmem [shape: bf16[32,4], index: 1, kind: input, shape index: {}]   ;;  %s1035_s2 = inlined_call_operand.vmem [shape: f32[32,1], index: 2, kind: input, shape index: {}]   ;;  %s1036_s3 = inlined_call_operand.vmem [shape: bf16[256,4], index: 3, kind: input, shape index: {}]   ;;  %s1037_s4 = inlined_call_operand.vmem [shape: f32[1,4], index: 4, kind: input, shape index: {}]   ;;  %s1038_s5 = inlined_call_operand.vmem [shape: f32[2,32,4], index: 5, kind: output, shape index: {}]  }
   0x1   :  { %s891_s20 = smov 0  }
   0x2 LB: > { %s27_s21 = sadd.s32 1, %s849_s19  ;;  %p703_p0 = scmp.ge.s32.totalorder %s853_s20, 1  ;;  %s853_s20 = sphi %s891_s20, %s15_s20   ;;  %s849_s19 = sphi %s889_s19, %s1040_s19   ;;  %s845_s18 = sphi %s887_s18, %s1039_s18  }
   0x3   : > { %p29_p1 = scmp.ge.s32.totalorder %s27_s21, 2  ;;  %p206_p2 = scmp.lt.s32.totalorder %s853_s20, 3 }
   0x5   : > { %s1042_s21 = smov (%p29_p1, %s27_s21), 0  ;;  %p207_p3 = pnand %p703_p0, %p206_p2 }
   0x6   : > { %p239_p4 = scmp.lt.s32.totalorder (!%p207_p3), %s845_s18, 1  ;;  %v855_v0 = vmov (!%p207_p3), 0   ;;  %v273_v1 = vld [vmem:[%s1035_s2] sm:$0xff] (!%p207_p3)  ;;  %v274_v2 = vld [vmem:[%s1035_s2 + $0x8] sm:$0xff] (!%p207_p3)  ;;  %v275_v3 = vld [vmem:[%s1035_s2 + $0x10] sm:$0xff] (!%p207_p3)  ;;  %vm314_vm0 = vcmask (!%p207_p3), 1041408  }
   0x7   : > { %210 = sbr.rel (%p207_p3) target bundleno = 725 (0x2d5), region = 40  ;;  %353 = vmatprep.mubr.bf16.mxu0 (!%p207_p3), %v855_v0  ;;  %806 = vset.pattern.permute.xlu0 (!%p207_p3), %v855_v0  ;;  %v276_v4 = vld [vmem:[%s1035_s2 + $0x18] sm:$0xff] (!%p207_p3)  ;;  %v811_v5 = vld [vmem:[%s1036_s3 + $0x40] sm:$0xff] (!%p207_p3)   ;;  %v813_v10 = vld [vmem:[%s1036_s3 + $0x48] sm:$0xff] (!%p207_p3)   ;;  %vm258_vm1 = vcmask (!%p207_p3), 31744   ;;  %v856_v60 = vmov (!%p207_p3), 0.0  }
   0x8   : > { %807 = vset.pattern.permute.xlu1 (!%p207_p3), %v855_v0  ;;  %279 = vperm.xlu0 (!%p207_p3), %806, %v273_v1   ;;  %v812_v7 = vld [vmem:[%s1036_s3] sm:$0xff] (!%p207_p3)   ;;  %v814_v14 = vld [vmem:[%s1036_s3 + $0x8] sm:$0xff] (!%p207_p3)   ;;  %v815_v15 = vld [vmem:[%s1036_s3 + $0x50] sm:$0xff] (!%p207_p3)  }
   0x9   : > { %289 = vperm.xlu1 (!%p207_p3), %807, %v275_v3   ;;  %762 = vmatprep.subr.bf16.mxu1 (!%p207_p3), %v811_v5  ;;  %v809_v13 = vld [vmem:[%s1034_s1] sm:$0xff] (!%p207_p3)   ;;  %v816_v16 = vld [vmem:[%s1036_s3 + $0x10] sm:$0xff] (!%p207_p3)   ;;  %v817_v17 = vld [vmem:[%s1036_s3 + $0x58] sm:$0xff] (!%p207_p3)  }
   0xa   : > { %770 = vmatpush3.bf16.msra.mxu1 (!%p207_p3), %v812_v7  ;;  %v810_v18 = vld [vmem:[%s1034_s1 + $0x8] sm:$0xff] (!%p207_p3)   ;;  %v818_v19 = vld [vmem:[%s1036_s3 + $0x18] sm:$0xff] (!%p207_p3)   ;;  %v819_v20 = vld [vmem:[%s1036_s3 + $0x60] sm:$0xff] (!%p207_p3)  }
   0xb   : > { %763 = vmatprep.subr.bf16.mxu1 (!%p207_p3), %v813_v10  ;;  %v820_v21 = vld [vmem:[%s1036_s3 + $0x20] sm:$0xff] (!%p207_p3)   ;;  %v821_v22 = vld [vmem:[%s1036_s3 + $0x68] sm:$0xff] (!%p207_p3)   ;;  %v823_v24 = vld [vmem:[%s1036_s3 + $0x70] sm:$0xff] (!%p207_p3)  }
   0xc   : > { %284 = vperm.xlu0 (!%p207_p3), %806, %v274_v2   ;;  %v822_v23 = vld [vmem:[%s1036_s3 + $0x28] sm:$0xff] (!%p207_p3)   ;;  %v824_v25 = vld [vmem:[%s1036_s3 + $0x30] sm:$0xff] (!%p207_p3)   ;;  %v825_v26 = vld [vmem:[%s1036_s3 + $0x78] sm:$0xff] (!%p207_p3)  }
   0xd   : > { %294 = vperm.xlu1 (!%p207_p3), %807, %v276_v4   ;;  %v826_v27 = vld [vmem:[%s1036_s3 + $0x38] sm:$0xff] (!%p207_p3)  }
   0xe   : > { %s1044_s18 = smov (!%p239_p4, %s845_s18), 1  ;;  %771 = vmatpush3.bf16.msra.mxu1 %v814_v14 }
   0xf   : > { %s732_s28 = sshll.u32 %s1044_s18, 3  ;;  %764 = vmatprep.subr.bf16.mxu1 %v815_v15 }
  0x10   : > { %s246_s8 = scalar_lea.vmem %s1033_s0, %s732_s28  ;;  %s733_s28 = sshll.u32 %s1044_s18, 5 }
  0x11   : > { %v263_v6 = vld [vmem:[%s246_s8] sm:$0xff]  ;;  %s983_s6 = scalar_lea.vmem %s1038_s5, %s733_s28 }
  0x12   : > { %v265_v8 = vcombine.high %v263_v6, %v263_v6  ;;  %v267_v9 = vpack.c.bf16 %v263_v6, %v263_v6  ;;  %772 = vmatpush3.bf16.msra.mxu1 %v816_v16  ;;  %259 = vst.msk [vmem:[%s983_s6] sm:$0xff] %vm258_vm1, %v856_v60  ;;  %260 = vst.msk [vmem:[%s983_s6 + $0x8] sm:$0xff] %vm258_vm1, %v856_v60 }
  0x13   : > { %765 = vmatprep.subr.bf16.mxu1 %v817_v17  ;;  %261 = vst.msk [vmem:[%s983_s6 + $0x10] sm:$0xff] %vm258_vm1, %v856_v60  ;;  %262 = vst.msk [vmem:[%s983_s6 + $0x18] sm:$0xff] %vm258_vm1, %v856_v60 }
  0x14   : > { %v268_v11 = vpack.c.bf16 %v265_v8, %v265_v8  ;;  %v316_v12 = vsel %vm314_vm0, %v267_v9, 0 }
  0x16   : > { %710 = vmatprep.subr.msk.bf16.mxu0 %vm314_vm0, %v268_v11  ;;  %773 = vmatpush3.bf16.msra.mxu1 %v818_v19 }
  0x17   : > { %322 = vmatpush1.bf16.msra.mxu0 %v316_v12  ;;  %766 = vmatprep.subr.bf16.mxu1 %v819_v20 }
  0x18   : > { %734 = vmatprep.subr.bf16.mxu0 %v811_v5 }
  0x19   : > { %v414_v62 = vld [vmem:[%s983_s6] sm:$0xff]  ;;  %v415_v2 = vld [vmem:[%s983_s6 + $0x8] sm:$0xff] }
  0x1a   : > { %711 = vmatmul.mubr.msk.bf16.vlgmr.msra.gmra.mrb[0].mxu0 %vm258_vm1, %v809_v13  ;;  %774 = vmatpush3.bf16.msra.mxu1 %v820_v21  ;;  %v416_v8 = vld [vmem:[%s983_s6 + $0x10] sm:$0xff]  ;;  %v417_v12 = vld [vmem:[%s983_s6 + $0x18] sm:$0xff] }
  0x1b   : > { %363 = vmatprep.mubr.bf16.mxu0 %v855_v0  ;;  %735 = vmatpush3.bf16.msra.mxu0 %v812_v7 }
  0x1c   : > { %736 = vmatprep.subr.bf16.mxu0 %v813_v10  ;;  %767 = vmatprep.subr.bf16.mxu1 %v821_v22 }
  0x1e   : > { %775 = vmatpush3.bf16.msra.mxu1 %v822_v23 }
  0x1f   : > { %737 = vmatpush3.bf16.msra.mxu0 %v814_v14  ;;  %768 = vmatprep.subr.bf16.mxu1 %v823_v24 }
  0x20   : > { %738 = vmatprep.subr.bf16.mxu0 %v815_v15 }
  0x22   : > { %712 = vmatmul.mubr.msk.bf16.gmra.mrb[4].mxu0 %vm258_vm1, %v810_v18  ;;  %776 = vmatpush3.bf16.msra.mxu1 %v824_v25 }
  0x23   : > { %739 = vmatpush3.bf16.msra.mxu0 %v816_v16  ;;  %769 = vmatprep.subr.bf16.mxu1 %v825_v26 }
  0x24   : > { %740 = vmatprep.subr.bf16.mxu0 %v817_v17  ;;  %v729_v17 = vld [vmem:[%s1037_s4] ss:$0 sm:$0xff] }
  0x26   : > { %777 = vmatpush3.bf16.msra.mxu1 %v826_v27 }
  0x27   : > { %741 = vmatpush3.bf16.msra.mxu0 %v818_v19 }
  0x28   : > { %742 = vmatprep.subr.bf16.mxu0 %v819_v20 }
  0x2b   : > { %743 = vmatpush3.bf16.msra.mxu0 %v820_v21 }
  0x2c   : > { %744 = vmatprep.subr.bf16.mxu0 %v821_v22 }
  0x2f   : > { %745 = vmatpush3.bf16.msra.mxu0 %v822_v23 }
  0x30   : > { %746 = vmatprep.subr.bf16.mxu0 %v823_v24 }
  0x33   : > { %747 = vmatpush3.bf16.msra.mxu0 %v824_v25 }
  0x34   : > { %748 = vmatprep.subr.bf16.mxu0 %v825_v26 }
  0x37   : > { %749 = vmatpush3.bf16.msra.mxu0 %v826_v27 }
  0x87   : > { %v280_v28 = vpop.permute.xlu0 %279 }
  0x88   : > { %v290_v37 = vpop.permute.xlu1 %289 }
  0x8b   : > { %v285_v30 = vpop.permute.xlu0 %284 }
  0x8c   : > { %v295_v48 = vpop.permute.xlu1 %294 }
  0xed   : > { %v355_v29 = vpop.f32.mrb[0].mxu0 }
  0xee   : > { %v356_v31 = vadd.f32 %v355_v29, %v280_v28  ;;  %v357_v32 = vpop.f32.mrb[1].mxu0 }
  0xef   : > { %v358_v33 = vadd.f32 %v357_v32, %v280_v28  ;;  %v359_v34 = vpop.f32.mrb[2].mxu0 }
  0xf0   : > { %v360_v35 = vadd.f32 %v359_v34, %v285_v30  ;;  %v361_v36 = vpop.f32.mrb[3].mxu0  ;;  %v374_v39 = vmax.f32 %v356_v31, 0.0 }
  0xf1   : > { %v362_v38 = vadd.f32 %v361_v36, %v285_v30  ;;  %v375_v41 = vmax.f32 %v358_v33, 0.0 }
  0xf2   : > { %v376_v40 = vmax.f32 %v360_v35, 0.0 }
  0xf3   : > { %v377_v42 = vmax.f32 %v362_v38, 0.0 }
  0xf4   : > { %v418_v43 = vpack.c.bf16 %v376_v40, %v374_v39 }
  0xf5   : > { %v419_v44 = vpack.c.bf16 %v377_v42, %v375_v41  ;;  %v365_v45 = vpop.f32.mrb[4].mxu0 }
  0xf6   : > { %v366_v46 = vadd.f32 %v365_v45, %v290_v37  ;;  %v367_v47 = vpop.f32.mrb[5].mxu0 }
  0xf7   : > { %v368_v49 = vadd.f32 %v367_v47, %v290_v37  ;;  %v369_v50 = vpop.f32.mrb[6].mxu0  ;;  %550 = vmatprep.mubr.bf16.mxu0 %v419_v44 }
  0xf8   : > { %v370_v51 = vadd.f32 %v369_v50, %v295_v48  ;;  %v371_v52 = vpop.f32.mrb[7].mxu0  ;;  %551 = vmatmul.mubr.bf16.vlgmr.msra.gmra.mrb[8].mxu0 %v418_v43  ;;  %v378_v54 = vmax.f32 %v366_v46, 0.0 }
  0xf9   : > { %v372_v53 = vadd.f32 %v371_v52, %v295_v48  ;;  %v379_v56 = vmax.f32 %v368_v49, 0.0 }
  0xfa   : > { %v380_v55 = vmax.f32 %v370_v51, 0.0 }
  0xfb   : > { %v381_v57 = vmax.f32 %v372_v53, 0.0 }
  0xfc   : > { %v420_v58 = vpack.c.bf16 %v380_v55, %v378_v54 }
  0xfd   : > { %v421_v59 = vpack.c.bf16 %v381_v57, %v379_v56 }
  0xff   : > { %558 = vmatprep.mubr.bf16.mxu1 %v421_v59 }
 0x100   : > { %559 = vmatmul.mubr.bf16.vlgmr.msra.gmra.mrb[0].mxu1 %v420_v58 }
 0x1cb   : > { %v750_v61 = vpop.f32.mrb[8].mxu0 }
 0x1cc   : > { %v751_v63 = vpop.f32.mrb[9].mxu0 }
 0x1cd   : > { %v752_v0 = vadd.f32 %v751_v63, %v750_v61  ;;  %v753_v1 = vpop.f32.mrb[10].mxu0 }
 0x1ce   : > { %v754_v3 = vpop.f32.mrb[11].mxu0 }
 0x1cf   : > { %v567_v4 = vadd.f32 %v752_v0, %v414_v62  ;;  %v755_v5 = vadd.f32 %v754_v3, %v753_v1 }
 0x1d1   : > { %571 = vst.msk [vmem:[%s983_s6] sm:$0xff] %vm258_vm1, %v567_v4  ;;  %v568_v6 = vadd.f32 %v755_v5, %v415_v2 }
 0x1d3   : > { %572 = vst.msk [vmem:[%s983_s6 + $0x8] sm:$0xff] %vm258_vm1, %v568_v6  ;;  %v756_v7 = vpop.f32.mrb[0].mxu1 }
 0x1d4   : > { %v757_v9 = vpop.f32.mrb[1].mxu1 }
 0x1d5   : > { %v758_v10 = vadd.f32 %v757_v9, %v756_v7  ;;  %v759_v11 = vpop.f32.mrb[2].mxu1 }
 0x1d6   : > { %v760_v13 = vpop.f32.mrb[3].mxu1 }
 0x1d7   : > { %v569_v14 = vadd.f32 %v758_v10, %v416_v8  ;;  %v761_v15 = vadd.f32 %v760_v13, %v759_v11 }
 0x1d8   : > { %v578_v16 = vld [vmem:[%s983_s6] sm:$0xff] }
 0x1d9   : > { %573 = vst.msk [vmem:[%s983_s6 + $0x10] sm:$0xff] %vm258_vm1, %v569_v14  ;;  %v570_v18 = vadd.f32 %v761_v15, %v417_v12  ;;  %v589_v20 = vmul.f32 %v729_v17, %v578_v16 }
 0x1da   : > { %v579_v19 = vld [vmem:[%s983_s6 + $0x8] sm:$0xff] }
 0x1db   : > { %574 = vst.msk [vmem:[%s983_s6 + $0x18] sm:$0xff] %vm258_vm1, %v570_v18  ;;  %v590_v21 = vmul.f32 %v729_v17, %v579_v19  ;;  %v593_v23 = vmul.f32 %v589_v20, %v589_v20 }
 0x1dd   : > { %v594_v22 = vmul.f32 %v590_v21, %v590_v21  ;;  %v597_v30 = vsel %vm258_vm1, %v593_v23, 0.0 }
 0x1df   : > { %v598_v26 = vsel %vm258_vm1, %v594_v22, 0.0 }
 0x1e0   : > { %v580_v24 = vld [vmem:[%s983_s6 + $0x10] sm:$0xff]  ;;  %v599_v31 = vadd.f32 %v598_v26, %v597_v30 }
 0x1e1   : > { %v591_v25 = vmul.f32 %v729_v17, %v580_v24 }
 0x1e2   : > { %v581_v27 = vld [vmem:[%s983_s6 + $0x18] sm:$0xff] }
 0x1e3   : > { %v592_v28 = vmul.f32 %v729_v17, %v581_v27  ;;  %v595_v29 = vmul.f32 %v591_v25, %v591_v25 }
 0x1e5   : > { %v596_v32 = vmul.f32 %v592_v28, %v592_v28  ;;  %v600_v33 = vsel %vm258_vm1, %v595_v29, 0.0 }
 0x1e6   : > { %v601_v34 = vadd.f32 %v600_v33, %v599_v31 }
 0x1e7   : > { %v602_v35 = vsel %vm258_vm1, %v596_v32, 0.0 }
 0x1e8   : > { %v603_v36 = vadd.f32 %v602_v35, %v601_v34 }
 0x1ea   : > { %604 = vadd.xlane.f32.xlu0 %v603_v36 }
 0x277   : > { %v605_v37 = vpop.xlane.xlu0 %604 }
 0x278   : > { %v606_v38 = vrot.slane %v605_v37, 4 }
 0x27a   : > { %v607_v39 = vadd.f32 %v606_v38, %v605_v37 }
 0x27c   : > { %v608_v40 = vrot.slane %v607_v39, 2 }
 0x27e   : > { %v609_v41 = vadd.f32 %v608_v40, %v607_v39 }
 0x280   : > { %v610_v42 = vrot.slane %v609_v41, 1 }
 0x282   : > { %v611_v43 = vadd.f32 %v610_v42, %v609_v41 }
 0x284   : > { %778 = vpush %v611_v43 }
 0x2b5   : > { %s779_s8 = spop %778 }
 0x2b6   : > { %v613_v44 = vstv %s779_s8 }
 0x2b7   : > { %827 = vrsqrt.f32 %v613_v44  ;;  %vm616_vm2 = vcmp.eq.f32.partialorder %v613_v44, inf  ;;  %v619_v47 = vand.u32 2147483648, %v613_v44  ;;  %vm618_vm3 = vcmp.eq.f32.partialorder %v613_v44, 0.0 }
 0x2c1   : > { %v828_v45 = vpop.eup %827 }
 0x2c2   : > { %v615_v46 = vmul.f32 %v828_v45, %v613_v44 }
 0x2c4   : > { %v617_v48 = vsel %vm616_vm2, %v613_v44, %v615_v46 }
 0x2c5   : > { %v620_v49 = vsel %vm618_vm3, %v619_v47, %v617_v48 }
 0x2c6   : > { %829 = vrcp.f32 %v620_v49 }
 0x2d0   : > { %v830_v50 = vpop.eup %829 }
 0x2d1   : > { %v622_v51 = vmul.f32 %v830_v50, %v589_v20  ;;  %v623_v52 = vmul.f32 %v830_v50, %v590_v21  ;;  %v624_v53 = vmul.f32 %v830_v50, %v591_v25  ;;  %v625_v54 = vmul.f32 %v830_v50, %v592_v28 }
 0x2d3   : > { %626 = vst.msk [vmem:[%s983_s6] sm:$0xff] %vm258_vm1, %v622_v51  ;;  %627 = vst.msk [vmem:[%s983_s6 + $0x8] sm:$0xff] %vm258_vm1, %v623_v52 }
 0x2d4   : > { %628 = vst.msk [vmem:[%s983_s6 + $0x10] sm:$0xff] %vm258_vm1, %v624_v53  ;;  %629 = vst.msk [vmem:[%s983_s6 + $0x18] sm:$0xff] %vm258_vm1, %v625_v54 }
 0x2d5 PF: > { %s15_s20 = sadd.s32 1, %s853_s20   ;;  %s1039_s18 = smov %s849_s19 }
 0x2d6   : > { %p12_p5 = scmp.ge.s32.totalorder %s15_s20, 4   ;;  %s1040_s19 = smov %s1042_s21 }
 0x2d8   :  { %14 = sbr.rel (!%p12_p5) target bundleno = 2 (0x2), region = 78 }

</bundles_post_ra>
